<compile_context>
chip_gen: v6e
topology: v6e:2x2x1
jax: 0.10.0
libtpu: 0.0.40
codegen_flags: <defaults>
</compile_context>

<pallas_src>
import numpy as np
import jax
import jax.numpy as jnp
from jax.experimental import pallas as pl
from jax.experimental.pallas import tpu as pltpu


# ---------------------------------------------------------------------------
# Kernels
# ---------------------------------------------------------------------------

def _dense_kernel(w_ref, x_ref, o_ref):
    # w_ref: (out_len, L)       averaging matrix (pad/stride/1/K folded in).
    # x_ref: (TB, L, TC)        batch-tile x lane-tile of the input.
    # o_ref: (TB, out_len, TC)
    w = w_ref[...]
    for i in range(x_ref.shape[0]):                      # unrolled over TB
        o_ref[i] = jnp.dot(
            w, x_ref[i], preferred_element_type=jnp.float32
        ).astype(o_ref.dtype)


def _banded_kernel(starts_ref, w_ref, x_ref, o_ref):
    # starts_ref: (n_to,) int32 in SMEM (scalar prefetch): slab start per tile.
    # w_ref:      (1, To, Band) banded weights for this out-length tile.
    # x_ref:      (TB, L, TC)   full-length block (resident across `to` steps).
    # o_ref:      (TB, To, TC)
    to = pl.program_id(2)
    start = pl.multiple_of(starts_ref[to], 8)            # starts built 8-aligned
    band = w_ref.shape[-1]
    w = w_ref[0]
    for i in range(x_ref.shape[0]):                      # unrolled over TB
        x_slab = x_ref[i, pl.ds(start, band), :]         # (Band, TC)
        o_ref[i] = jnp.dot(
            w, x_slab, preferred_element_type=jnp.float32
        ).astype(o_ref.dtype)


# ---------------------------------------------------------------------------
# Trace-time weight construction
# ---------------------------------------------------------------------------

def _round_up(v, m):
    return -(-v // m) * m


def _build_dense_w(L, kernel_size, stride, dtype):
    """(out_len, L) matrix W with edge padding, stride and 1/K folded in."""
    pad = (kernel_size - 1) // 2
    out_len = (L + 2 * pad - kernel_size) // stride + 1
    t = np.arange(out_len)[:, None]
    k = np.arange(kernel_size)[None, :]
    src = np.clip(t * stride + k - pad, 0, L - 1)
    W = np.zeros((out_len, L), np.float32)
    rows = np.repeat(np.arange(out_len), kernel_size)
    np.add.at(W, (rows, src.ravel()), 1.0 / kernel_size)
    return jnp.asarray(W, dtype=dtype), out_len


def _choose_out_tile(out_len, L, kernel_size, stride):
    """Pick (To, Band) for the banded path, or None to use the dense path."""
    if L % 8 != 0:
        return None
    for To in (256, 128, 64, 32, 16, 8):
        if out_len % To != 0 or out_len // To < 2:
            continue
        band = _round_up((To - 1) * stride + kernel_size + 7, 8)
        if band <= L:
            return To, band
    return None


def _build_banded_w(L, out_len, kernel_size, stride, To, band, dtype):
    """Banded weights (n_to, To, Band) plus 8-aligned slab starts (n_to,)."""
    pad = (kernel_size - 1) // 2
    n_to = out_len // To
    starts = np.zeros((n_to,), np.int32)
    W = np.zeros((n_to, To, band), np.float32)
    rows = np.repeat(np.arange(To), kernel_size)
    k = np.arange(kernel_size)[None, :]
    for to in range(n_to):
        t0 = to * To
        s0 = min(max((t0 * stride - pad) // 8 * 8, 0), L - band)
        starts[to] = s0
        t = t0 + np.arange(To)[:, None]
        src = np.clip(t * stride + k - pad, 0, L - 1)
        np.add.at(W[to], (rows, (src - s0).ravel()), 1.0 / kernel_size)
    return jnp.asarray(W, dtype=dtype), jnp.asarray(starts)


# ---------------------------------------------------------------------------
# Wrapper
# ---------------------------------------------------------------------------

def moving_avg(x, kernel_size, stride):
    """Pallas equivalent of UMixer.moving_avg.forward, x: [B, L, C]."""
    B, L, C = x.shape
    pad = (kernel_size - 1) // 2
    out_len = (L + 2 * pad - kernel_size) // stride + 1
    itemsize = jnp.dtype(x.dtype).itemsize

    # Channel (lane) tile: largest multiple-of-128 divisor of C, up to 512.
    TC = next((t for t in range(512, 0, -128) if C % t == 0), C)
    # TODO(synk): for production shapes with C % 128 != 0, pad C to a multiple
    # of 128 on the caller side to avoid masked partial stores.
    n_ct = C // TC

    # Batch tile: largest divisor of B keeping the x block <= ~4 MiB.
    TB = 1
    for tb in range(B, 0, -1):
        if B % tb == 0 and tb * L * TC * itemsize <= (4 << 20):
            TB = tb
            break
    n_bt = B // TB

    tile = _choose_out_tile(out_len, L, kernel_size, stride)

    if tile is None:
        # ------------------------ dense path (short sequences) -------------
        W, _ = _build_dense_w(L, kernel_size, stride, x.dtype)
        w_bytes = out_len * L * itemsize
        x_bytes = TB * L * TC * itemsize
        o_bytes = TB * out_len * TC * itemsize
        cost = pl.CostEstimate(
            flops=2 * B * out_len * L * C,
            transcendentals=0,
            bytes_accessed=B * (L + out_len) * C * itemsize + w_bytes,
        )
        vmem_limit = int(min(max(2 * (w_bytes + x_bytes + o_bytes) + (8 << 20),
                                 32 << 20), 48 << 20))
        return pl.pallas_call(
            _dense_kernel,
            out_shape=jax.ShapeDtypeStruct((B, out_len, C), x.dtype),
            grid_spec=pltpu.PrefetchScalarGridSpec(
                num_scalar_prefetch=0,
                grid=(n_bt, n_ct),
                in_specs=[
                    # W: constant block index -> fetched once, stays resident.
                    pl.BlockSpec((out_len, L), lambda b, c: (0, 0)),
                    pl.BlockSpec((TB, L, TC), lambda b, c: (b, 0, c)),
                ],
                out_specs=pl.BlockSpec((TB, out_len, TC), lambda b, c: (b, 0, c)),
            ),
            compiler_params=pltpu.CompilerParams(
                dimension_semantics=("parallel", "parallel"),
                vmem_limit_bytes=vmem_limit,
            ),
            cost_estimate=cost,
        )(W, x)

    # ---------------------------- banded path ------------------------------
    To, band = tile
    n_to = out_len // To
    W, starts = _build_banded_w(L, out_len, kernel_size, stride, To, band,
                                x.dtype)
    w_bytes = To * band * itemsize
    x_bytes = TB * L * TC * itemsize
    o_bytes = TB * To * TC * itemsize
    cost = pl.CostEstimate(
        flops=2 * B * out_len * band * C,
        transcendentals=0,
        bytes_accessed=(B * (L + out_len) * C * itemsize
                        + n_to * To * band * itemsize),
    )
    vmem_limit = int(min(max(2 * (w_bytes + x_bytes + o_bytes) + (8 << 20),
                             32 << 20), 48 << 20))
    return pl.pallas_call(
        _banded_kernel,
        out_shape=jax.ShapeDtypeStruct((B, out_len, C), x.dtype),
        grid_spec=pltpu.PrefetchScalarGridSpec(
            num_scalar_prefetch=1,                 # slab starts -> SMEM
            grid=(n_bt, n_ct, n_to),
            in_specs=[
                pl.BlockSpec((1, To, band),
                             lambda b, c, to, starts: (to, 0, 0)),
                # x: block index constant along `to` -> DMA'd once per (b, c).
                pl.BlockSpec((TB, L, TC),
                             lambda b, c, to, starts: (b, 0, c)),
            ],
            out_specs=pl.BlockSpec((TB, To, TC),
                                   lambda b, c, to, starts: (b, to, c)),
        ),
        compiler_params=pltpu.CompilerParams(
            dimension_semantics=("parallel", "parallel", "arbitrary"),
            vmem_limit_bytes=vmem_limit,
        ),
        cost_estimate=cost,
    )(starts, W, x)


# ---------------------------------------------------------------------------
# Reference + self-test
# ---------------------------------------------------------------------------

def _reference_moving_avg(x, kernel_size, stride):
    """Pure-JAX (f32) reference mirroring the PyTorch forward."""
    pad = (kernel_size - 1) // 2
    x = x.astype(jnp.float32)
    front = jnp.repeat(x[:, 0:1, :], pad, axis=1)
    end = jnp.repeat(x[:, -1:, :], pad, axis=1)
    xp = jnp.concatenate([front, x, end], axis=1)
    L_pad = xp.shape[1]
    out_len = (L_pad - kernel_size) // stride + 1
    outs = [
        jnp.mean(xp[:, t * stride: t * stride + kernel_size, :], axis=1)
        for t in range(out_len)
    ]
    return jnp.stack(outs, axis=1)


if __name__ == "__main__":
    key = jax.random.PRNGKey(0)
    configs = [
        # (B, L, C, kernel_size, stride, dtype, tol)
        (2, 16, 8, 5, 1, jnp.float32, 1e-5),       # dense fallback, odd K
        (2, 16, 8, 4, 2, jnp.float32, 1e-5),       # even K + stride 2
        (2, 32, 256, 25, 1, jnp.float32, 1e-5),    # lane-tiled dense (TC=256)
        (2, 256, 128, 25, 1, jnp.float32, 1e-5),   # banded path (To=128)
        (2, 128, 128, 25, 1, jnp.bfloat16, 5e-2),  # banded, native-bf16 MXU
    ]
    for i, (B, L, C, K, S, dt, tol) in enumerate(configs):
        k = jax.random.fold_in(key, i)
        x = jax.random.normal(k, (B, L, C), dtype=jnp.float32).astype(dt)
        out = jax.block_until_ready(moving_avg(x, K, S))
        ref = _reference_moving_avg(x, K, S)
        assert out.shape == ref.shape, (out.shape, ref.shape)
        err = float(jnp.max(jnp.abs(out.astype(jnp.float32) - ref)))
        assert err <= tol, (i, err)
    print("KERNEL_OK")
</pallas_src>

<mosaic_0001>
module attributes {stable_mosaic.version = 11 : i64} {
  func.func @_dense_kernel(%arg0: i32, %arg1: i32, %arg2: memref<16x16xf32, #tpu.memory_space<vmem>>, %arg3: memref<2x16x8xf32, #tpu.memory_space<vmem>>, %arg4: memref<2x16x8xf32, #tpu.memory_space<vmem>>) attributes {dimension_semantics = [#tpu.dimension_semantics<parallel>, #tpu.dimension_semantics<parallel>], iteration_bounds = array<i64: 1, 1>, scalar_prefetch = 0 : i64, scratch_operands = 0 : i64, tpu.core_type = #tpu.core_type<tc>, window_params = [{pipeline_mode = #tpu.pipeline_mode<synchronous>, transform_indices = @transform_0, window_bounds = array<i64: 16, 16>}, {transform_indices = @transform_1, window_bounds = array<i64: 2, 16, 8>}, {transform_indices = @transform_2, window_bounds = array<i64: 2, 16, 8>}]} {
    %c0 = arith.constant 0 : index
    %c0_0 = arith.constant 0 : index
    %0 = vector.load %arg2[%c0, %c0_0] : memref<16x16xf32, #tpu.memory_space<vmem>>, vector<16x16xf32>
    %c0_1 = arith.constant 0 : index
    %c0_2 = arith.constant 0 : index
    %c0_3 = arith.constant 0 : index
    %1 = vector.load %arg3[%c0_1, %c0_2, %c0_3] : memref<2x16x8xf32, #tpu.memory_space<vmem>>, vector<1x16x8xf32>
    %2 = vector.shape_cast %1 : vector<1x16x8xf32> to vector<16x8xf32>
    %cst = arith.constant dense<0.000000e+00> : vector<16x8xf32>
    %3 = tpu.matmul %0, %2, %cst {dimension_numbers = #tpu.dot_dimension_numbers<[1], [0], [0], [1], [0, 0, 1, 1], [], []>} : vector<16x16xf32>, vector<16x8xf32>, vector<16x8xf32> -> vector<16x8xf32>
    %c0_4 = arith.constant 0 : index
    %c0_5 = arith.constant 0 : index
    %c0_6 = arith.constant 0 : index
    %4 = vector.load %arg4[%c0_4, %c0_5, %c0_6] : memref<2x16x8xf32, #tpu.memory_space<vmem>>, vector<1x16x8xf32>
    %5 = vector.shape_cast %4 : vector<1x16x8xf32> to vector<16x8xf32>
    %6 = vector.shape_cast %3 : vector<16x8xf32> to vector<1x16x8xf32>
    tpu.vector_store %arg4[%c0_4, %c0_5, %c0_6], %6 {strides = array<i32>} : memref<2x16x8xf32, #tpu.memory_space<vmem>>, vector<1x16x8xf32>,
    %c1 = arith.constant 1 : index
    %c0_7 = arith.constant 0 : index
    %c0_8 = arith.constant 0 : index
    %7 = vector.load %arg3[%c1, %c0_7, %c0_8] : memref<2x16x8xf32, #tpu.memory_space<vmem>>, vector<1x16x8xf32>
    %8 = vector.shape_cast %7 : vector<1x16x8xf32> to vector<16x8xf32>
    %cst_9 = arith.constant dense<0.000000e+00> : vector<16x8xf32>
    %9 = tpu.matmul %0, %8, %cst_9 {dimension_numbers = #tpu.dot_dimension_numbers<[1], [0], [0], [1], [0, 0, 1, 1], [], []>} : vector<16x16xf32>, vector<16x8xf32>, vector<16x8xf32> -> vector<16x8xf32>
    %c1_10 = arith.constant 1 : index
    %c0_11 = arith.constant 0 : index
    %c0_12 = arith.constant 0 : index
    %10 = vector.load %arg4[%c1_10, %c0_11, %c0_12] : memref<2x16x8xf32, #tpu.memory_space<vmem>>, vector<1x16x8xf32>
    %11 = vector.shape_cast %10 : vector<1x16x8xf32> to vector<16x8xf32>
    %12 = vector.shape_cast %9 : vector<16x8xf32> to vector<1x16x8xf32>
    tpu.vector_store %arg4[%c1_10, %c0_11, %c0_12], %12 {strides = array<i32>} : memref<2x16x8xf32, #tpu.memory_space<vmem>>, vector<1x16x8xf32>,
    return
  }
  func.func @transform_0(%arg0: i32, %arg1: i32) -> (i32, i32) {
    %c0_i32 = arith.constant 0 : i32
    %c0_i32_0 = arith.constant 0 : i32
    %c0_i32_1 = arith.constant 0 : i32
    return %c0_i32, %c0_i32_0 : i32, i32
  }
  func.func @transform_1(%arg0: i32, %arg1: i32) -> (i32, i32, i32) {
    %c0_i32 = arith.constant 0 : i32
    %c0_i32_0 = arith.constant 0 : i32
    return %arg0, %c0_i32, %arg1 : i32, i32, i32
  }
  func.func @transform_2(%arg0: i32, %arg1: i32) -> (i32, i32, i32) {
    %c0_i32 = arith.constant 0 : i32
    %c0_i32_0 = arith.constant 0 : i32
    return %arg0, %c0_i32, %arg1 : i32, i32, i32
  }
}

</mosaic_0001>

<bundles_post_ra>
// kernel: tpu_custom_call.1
= control target key start
LH: loop header
LB: loop body
LE: loop exit
PB: predicated region body
PF: predicated region fallthrough
CT: control target
= control target key end

     0   :  { %vm15_vm0 = vcmask 130048   ;;  %vm97_vm1 = vcmask 64512   ;;  %s260_s1 = inlined_call_operand.vmem [shape: f32[2,16,8], index: 1, kind: input, shape index: {}]   ;;  %s261_s0 = inlined_call_operand.vmem [shape: f32[16,16], index: 0, kind: input, shape index: {}]   ;;  %s262_s2 = inlined_call_operand.vmem [shape: f32[2,16,8], index: 2, kind: output, shape index: {}]  }
   0x1   :  { %v14_v0 = vld [vmem:[%s260_s1 + $0x8] sm:$0xff]  ;;  %v188_v1 = vld [vmem:[%s260_s1 + $0x18] sm:$0xff]  ;;  %v13_v2 = vld [vmem:[%s260_s1] sm:$0xff] }
   0x2   :  { %201 = vmatprep.subr.mxu0 %v14_v0  ;;  %208 = vmatprep.subr.mxu1 %v188_v1  ;;  %v187_v3 = vld [vmem:[%s260_s1 + $0x10] sm:$0xff]  ;;  %v11_v4 = vld [vmem:[%s261_s0] sm:$0xff]  ;;  %v12_v5 = vld [vmem:[%s261_s0 + $0x8] sm:$0xff] }
   0x3   :  { %202 = vmatpush3.msra.mxu0 %v14_v0  ;;  %209 = vmatpush3.msra.mxu1 %v188_v1 }
   0x4   :  { %203 = vmatprep.subr.mxu0 %v13_v2  ;;  %210 = vmatprep.subr.mxu1 %v187_v3 }
   0x5   :  { %204 = vmatpush3.msra.mxu0 %v13_v2  ;;  %205 = vmatprep.mubr.msk.f32.mxu0 %vm15_vm0, %v11_v4 }
   0x6   :  { %211 = vmatpush3.msra.mxu1 %v187_v3  ;;  %212 = vmatprep.mubr.msk.f32.mxu1 %vm15_vm0, %v11_v4 }
   0x7   :  { %206 = vmatmul.mubr.msk.f32.vlgmr.msra.gmra.mxu0 %vm15_vm0, %v12_v5  ;;  %213 = vmatmul.mubr.msk.f32.vlgmr.msra.gmra.mxu1 %vm15_vm0, %v12_v5 }
  0xc7   :  { %v207_v6 = vpop.f32.mrf.mxu0  ;;  %v214_v7 = vpop.f32.mrf.mxu1 }
  0xc8   :  { %99 = vst.msk [vmem:[%s262_s2 + $0x8] sm:$0xff] %vm97_vm1, %v207_v6  ;;  %192 = vst.msk [vmem:[%s262_s2 + $0x18] sm:$0xff] %vm97_vm1, %v214_v7 }
  0xc9   :  { %v88_v8 = vpop.f32.mrf.mxu0  ;;  %v169_v9 = vpop.f32.mrf.mxu1 }
  0xca   :  { %98 = vst.msk [vmem:[%s262_s2] sm:$0xff] %vm97_vm1, %v88_v8  ;;  %191 = vst.msk [vmem:[%s262_s2 + $0x10] sm:$0xff] %vm97_vm1, %v169_v9 }

</bundles_post_ra>
